<compile_context>
chip_gen: v5e
topology: v5e:2x2
jax: 0.10.0
libtpu: 0.0.40
codegen_flags: <defaults>
</compile_context>

<pallas_src>
import functools

import jax
import jax.numpy as jnp
from jax.experimental import pallas as pl
from jax.experimental.pallas import tpu as pltpu


# ------------------------------------------------------------------
# Fused kernel: conv3x3 (im2col matmul) + bias + ReLU + global avg pool (MXU dot)
#               + summed-head linear (lane-dense, 128-padded classes)
# One grid step == `batch_block` batch elements.
# ------------------------------------------------------------------
def _fused_kernel(p_ref, wc_ref, bc_ref, pool_ref, wh_ref, bh_ref, o_ref):
    # p_ref   : (1, Mb, K)          im2col patches, Mb = batch_block*H*W, K = 9*Cin, bf16
    # wc_ref  : (K, Cout)           flat conv weights, bf16
    # bc_ref  : (1, Cout)           conv bias, f32
    # pool_ref: (batch_block, Mb)   block-diagonal pooling matrix pre-scaled by 1/(H*W), bf16
    # wh_ref  : (Cout, NC_PAD)      summed head weights, classes padded to 128 lanes, bf16
    # bh_ref  : (1, NC_PAD)         summed head biases (padded), f32
    # o_ref   : (1, batch_block, NC_PAD) f32
    patches = p_ref[0]                                                     # (Mb, K)

    # Single K=9*Cin conv matmul (replaces nine K=Cin dots), f32 accumulation on the MXU.
    acc = jnp.dot(patches, wc_ref[...], preferred_element_type=jnp.float32)  # (Mb, Cout)
    feat = jnp.maximum(acc + bc_ref[...], 0.0)                                # bias + ReLU, f32

    # Global average pool as an MXU dot (MXU is otherwise idle here): (bblk, Mb)@(Mb, Cout).
    pooled = jnp.dot(pool_ref[...], feat.astype(jnp.bfloat16),
                     preferred_element_type=jnp.float32)                     # (bblk, Cout)

    # Sum of linear heads collapsed into one matmul against pre-summed, lane-dense weights.
    out = jnp.dot(pooled.astype(jnp.bfloat16), wh_ref[...],
                  preferred_element_type=jnp.float32) + bh_ref[...]          # (bblk, NC_PAD)
    o_ref[0] = out.astype(o_ref.dtype)


# ------------------------------------------------------------------
# Full forward: MultiLayerSumHeadModel.forward
# ------------------------------------------------------------------
@functools.partial(jax.jit, static_argnames=("batch_block",))
def multi_layer_sum_head_forward(x_nchw, conv_w, conv_b, head_w, head_b, *, batch_block=1):
    B, Cin, H, W = x_nchw.shape
    kh, kw, _, Cout = conv_w.shape
    num_heads, _, num_classes = head_w.shape
    assert B % batch_block == 0, (B, batch_block)

    M = H * W
    K = kh * kw * Cin
    Bg = B // batch_block
    Mb = batch_block * M
    NC_PAD = ((num_classes + 127) // 128) * 128          # lane-dense output store

    # im2col in the wrapper (tap-major), ~36 KB/image in bf16 -> one K=36 MXU dot in the kernel.
    x_nhwc = jnp.transpose(x_nchw, (0, 2, 3, 1))
    xp = jnp.pad(x_nhwc, ((0, 0), (1, 1), (1, 1), (0, 0)))
    taps = [xp[:, di:di + H, dj:dj + W, :] for di in range(kh) for dj in range(kw)]
    patches = jnp.stack(taps, axis=3).reshape(B, M, K)
    # Stack `batch_block` images per grid step (amortizes the ~0.35-0.6 us per-step overhead on
    # single-TC v5e/v6e); keep batch_block=1 on v7x so the "parallel" grid axis shards images
    # across its two TensorCores.
    patches = patches.reshape(Bg, Mb, K).astype(jnp.bfloat16)

    wc = conv_w.reshape(K, Cout).astype(jnp.bfloat16)          # flat, lane-dense conv weights
    bc = conv_b.reshape(1, Cout).astype(jnp.float32)           # epilogue stays f32
    # Heads collapsed + class dim padded to 128 lanes.
    wh = jnp.zeros((Cout, NC_PAD), jnp.float32).at[:, :num_classes].set(jnp.sum(head_w, axis=0))
    wh = wh.astype(jnp.bfloat16)
    bh = jnp.zeros((1, NC_PAD), jnp.float32).at[0, :num_classes].set(jnp.sum(head_b, axis=0))
    # Block-diagonal pooling matrix pre-scaled by 1/(H*W): row r averages image r's rows.
    pool = (jnp.repeat(jnp.eye(batch_block, dtype=jnp.float32), M, axis=1)
            / float(M)).astype(jnp.bfloat16)

    out = pl.pallas_call(
        _fused_kernel,
        out_shape=jax.ShapeDtypeStruct((Bg, batch_block, NC_PAD), jnp.float32),
        grid=(Bg,),
        in_specs=[
            pl.BlockSpec((1, Mb, K), lambda g: (g, 0, 0)),
            pl.BlockSpec((K, Cout), lambda g: (0, 0)),
            pl.BlockSpec((1, Cout), lambda g: (0, 0)),
            pl.BlockSpec((batch_block, Mb), lambda g: (0, 0)),
            pl.BlockSpec((Cout, NC_PAD), lambda g: (0, 0)),
            pl.BlockSpec((1, NC_PAD), lambda g: (0, 0)),
        ],
        out_specs=pl.BlockSpec((1, batch_block, NC_PAD), lambda g: (g, 0, 0)),
        compiler_params=pltpu.CompilerParams(
            dimension_semantics=("parallel",),
        ),
    )(patches, wc, bc, pool, wh, bh)

    return out.reshape(B, NC_PAD)[:, :num_classes]


# ------------------------------------------------------------------
# Pure-JAX reference (f32) for the correctness check
# ------------------------------------------------------------------
def reference(x_nchw, conv_w, conv_b, head_w, head_b):
    x_nhwc = jnp.transpose(x_nchw, (0, 2, 3, 1))
    feats = jax.lax.conv_general_dilated(
        x_nhwc, conv_w, window_strides=(1, 1), padding="SAME",
        dimension_numbers=("NHWC", "HWIO", "NHWC")) + conv_b
    feats = jnp.maximum(feats, 0.0)
    pooled = feats.mean(axis=(1, 2))                   # AdaptiveAvgPool2d((1,1)) + flatten
    num_heads = head_w.shape[0]
    return sum(pooled @ head_w[h] + head_b[h] for h in range(num_heads))


if __name__ == "__main__":
    B, Cin, H, W = 2, 4, 16, 16
    hidden_dim, num_classes, num_heads = 32, 10, 4

    key = jax.random.PRNGKey(0)
    k1, k2, k3, k4, k5 = jax.random.split(key, 5)
    x_nchw = jax.random.normal(k1, (B, Cin, H, W), jnp.float32)
    conv_w = jax.random.normal(k2, (3, 3, Cin, hidden_dim), jnp.float32) * 0.1   # HWIO
    conv_b = jax.random.normal(k3, (hidden_dim,), jnp.float32) * 0.1
    head_w = jax.random.normal(k4, (num_heads, hidden_dim, num_classes), jnp.float32) * 0.1
    head_b = jax.random.normal(k5, (num_heads, num_classes), jnp.float32) * 0.1

    ref = reference(x_nchw, conv_w, conv_b, head_w, head_b)

    # v7x-style path: one image per ("parallel") grid step -> both TensorCores busy at B=2.
    out = jax.block_until_ready(
        multi_layer_sum_head_forward(x_nchw, conv_w, conv_b, head_w, head_b, batch_block=1))
    assert out.shape == (B, num_classes), out.shape
    assert jnp.allclose(out, ref, rtol=2e-2, atol=2e-2), (out, ref)   # bf16 MXU path tolerance

    # v5e/v6e-style path: all images stacked into one grid step (amortizes per-step overhead).
    out2 = jax.block_until_ready(
        multi_layer_sum_head_forward(x_nchw, conv_w, conv_b, head_w, head_b, batch_block=B))
    assert jnp.allclose(out2, ref, rtol=2e-2, atol=2e-2), (out2, ref)

    print("KERNEL_OK")
</pallas_src>

<mosaic_0001>
module attributes {stable_mosaic.version = 11 : i64} {
  func.func @_fused_kernel(%arg0: i32, %arg1: memref<1x256x36xbf16, #tpu.memory_space<vmem>>, %arg2: memref<36x32xbf16, #tpu.memory_space<vmem>>, %arg3: memref<1x32xf32, #tpu.memory_space<vmem>>, %arg4: memref<1x256xbf16, #tpu.memory_space<vmem>>, %arg5: memref<32x128xbf16, #tpu.memory_space<vmem>>, %arg6: memref<1x128xf32, #tpu.memory_space<vmem>>, %arg7: memref<1x1x128xf32, #tpu.memory_space<vmem>>) attributes {dimension_semantics = [#tpu.dimension_semantics<parallel>], iteration_bounds = array<i64: 2>, scalar_prefetch = 0 : i64, scratch_operands = 0 : i64, tpu.core_type = #tpu.core_type<tc>, window_params = [{transform_indices = @transform_0, window_bounds = array<i64: 1, 256, 36>}, {pipeline_mode = #tpu.pipeline_mode<synchronous>, transform_indices = @transform_1, window_bounds = array<i64: 36, 32>}, {pipeline_mode = #tpu.pipeline_mode<synchronous>, transform_indices = @transform_2, window_bounds = array<i64: 1, 32>}, {pipeline_mode = #tpu.pipeline_mode<synchronous>, transform_indices = @transform_3, window_bounds = array<i64: 1, 256>}, {pipeline_mode = #tpu.pipeline_mode<synchronous>, transform_indices = @transform_4, window_bounds = array<i64: 32, 128>}, {pipeline_mode = #tpu.pipeline_mode<synchronous>, transform_indices = @transform_5, window_bounds = array<i64: 1, 128>}, {transform_indices = @transform_6, window_bounds = array<i64: 1, 1, 128>}]} {
    %c0 = arith.constant 0 : index
    %c0_0 = arith.constant 0 : index
    %c0_1 = arith.constant 0 : index
    %0 = vector.load %arg1[%c0, %c0_0, %c0_1] : memref<1x256x36xbf16, #tpu.memory_space<vmem>>, vector<1x256x36xbf16>
    %1 = vector.shape_cast %0 : vector<1x256x36xbf16> to vector<256x36xbf16>
    %c0_2 = arith.constant 0 : index
    %c0_3 = arith.constant 0 : index
    %2 = vector.load %arg2[%c0_2, %c0_3] : memref<36x32xbf16, #tpu.memory_space<vmem>>, vector<36x32xbf16>
    %cst = arith.constant dense<0.000000e+00> : vector<256x32xf32>
    %3 = tpu.matmul %1, %2, %cst {dimension_numbers = #tpu.dot_dimension_numbers<[1], [0], [0], [1], [0, 0, 1, 1], [], []>} : vector<256x36xbf16>, vector<36x32xbf16>, vector<256x32xf32> -> vector<256x32xf32>
    %c0_4 = arith.constant 0 : index
    %c0_5 = arith.constant 0 : index
    %4 = vector.load %arg3[%c0_4, %c0_5] : memref<1x32xf32, #tpu.memory_space<vmem>>, vector<1x32xf32>
    %5 = vector.broadcast %4 : vector<1x32xf32> to vector<256x32xf32>
    %6 = arith.addf %3, %5 : vector<256x32xf32>
    %cst_6 = arith.constant 0.000000e+00 : f32
    %7 = vector.broadcast %cst_6 : f32 to vector<256x32xf32>
    %8 = arith.maximumf %6, %7 : vector<256x32xf32>
    %c0_7 = arith.constant 0 : index
    %c0_8 = arith.constant 0 : index
    %9 = vector.load %arg4[%c0_7, %c0_8] : memref<1x256xbf16, #tpu.memory_space<vmem>>, vector<1x256xbf16>
    %10 = arith.truncf %8 : vector<256x32xf32> to vector<256x32xbf16>
    %cst_9 = arith.constant dense<0.000000e+00> : vector<1x32xf32>
    %11 = tpu.matmul %9, %10, %cst_9 {dimension_numbers = #tpu.dot_dimension_numbers<[1], [0], [0], [1], [0, 0, 1, 1], [], []>} : vector<1x256xbf16>, vector<256x32xbf16>, vector<1x32xf32> -> vector<1x32xf32>
    %12 = arith.truncf %11 : vector<1x32xf32> to vector<1x32xbf16>
    %c0_10 = arith.constant 0 : index
    %c0_11 = arith.constant 0 : index
    %13 = vector.load %arg5[%c0_10, %c0_11] : memref<32x128xbf16, #tpu.memory_space<vmem>>, vector<32x128xbf16>
    %cst_12 = arith.constant dense<0.000000e+00> : vector<1x128xf32>
    %14 = tpu.matmul %12, %13, %cst_12 {dimension_numbers = #tpu.dot_dimension_numbers<[1], [0], [0], [1], [0, 0, 1, 1], [], []>} : vector<1x32xbf16>, vector<32x128xbf16>, vector<1x128xf32> -> vector<1x128xf32>
    %c0_13 = arith.constant 0 : index
    %c0_14 = arith.constant 0 : index
    %15 = vector.load %arg6[%c0_13, %c0_14] : memref<1x128xf32, #tpu.memory_space<vmem>>, vector<1x128xf32>
    %16 = arith.addf %14, %15 : vector<1x128xf32>
    %c0_15 = arith.constant 0 : index
    %c0_16 = arith.constant 0 : index
    %c0_17 = arith.constant 0 : index
    %17 = vector.load %arg7[%c0_15, %c0_16, %c0_17] : memref<1x1x128xf32, #tpu.memory_space<vmem>>, vector<1x1x128xf32>
    %18 = vector.shape_cast %17 : vector<1x1x128xf32> to vector<1x128xf32>
    %19 = vector.shape_cast %16 : vector<1x128xf32> to vector<1x1x128xf32>
    tpu.vector_store %arg7[%c0_15, %c0_16, %c0_17], %19 {strides = array<i32>} : memref<1x1x128xf32, #tpu.memory_space<vmem>>, vector<1x1x128xf32>,
    return
  }
  func.func @transform_0(%arg0: i32) -> (i32, i32, i32) {
    %c0_i32 = arith.constant 0 : i32
    %c0_i32_0 = arith.constant 0 : i32
    %c0_i32_1 = arith.constant 0 : i32
    return %arg0, %c0_i32, %c0_i32_0 : i32, i32, i32
  }
  func.func @transform_1(%arg0: i32) -> (i32, i32) {
    %c0_i32 = arith.constant 0 : i32
    %c0_i32_0 = arith.constant 0 : i32
    %c0_i32_1 = arith.constant 0 : i32
    return %c0_i32, %c0_i32_0 : i32, i32
  }
  func.func @transform_2(%arg0: i32) -> (i32, i32) {
    %c0_i32 = arith.constant 0 : i32
    %c0_i32_0 = arith.constant 0 : i32
    %c0_i32_1 = arith.constant 0 : i32
    return %c0_i32, %c0_i32_0 : i32, i32
  }
  func.func @transform_3(%arg0: i32) -> (i32, i32) {
    %c0_i32 = arith.constant 0 : i32
    %c0_i32_0 = arith.constant 0 : i32
    %c0_i32_1 = arith.constant 0 : i32
    return %c0_i32, %c0_i32_0 : i32, i32
  }
  func.func @transform_4(%arg0: i32) -> (i32, i32) {
    %c0_i32 = arith.constant 0 : i32
    %c0_i32_0 = arith.constant 0 : i32
    %c0_i32_1 = arith.constant 0 : i32
    return %c0_i32, %c0_i32_0 : i32, i32
  }
  func.func @transform_5(%arg0: i32) -> (i32, i32) {
    %c0_i32 = arith.constant 0 : i32
    %c0_i32_0 = arith.constant 0 : i32
    %c0_i32_1 = arith.constant 0 : i32
    return %c0_i32, %c0_i32_0 : i32, i32
  }
  func.func @transform_6(%arg0: i32) -> (i32, i32, i32) {
    %c0_i32 = arith.constant 0 : i32
    %c0_i32_0 = arith.constant 0 : i32
    %c0_i32_1 = arith.constant 0 : i32
    return %arg0, %c0_i32, %c0_i32_0 : i32, i32, i32
  }
}

</mosaic_0001>

<bundles_post_ra>
// kernel: multi_layer_sum_head_forward.1
= control target key start
LH: loop header
LB: loop body
LE: loop exit
PB: predicated region body
PF: predicated region fallthrough
CT: control target
= control target key end

     0   :  { %11 = vsyncpa [#allocation3], 0  ;;  %s1179_s0 = inlined_call_operand.vmem [shape: bf16[2,256,36], index: 0, kind: input, shape index: {}]   ;;  %s1180_s1 = inlined_call_operand.vmem [shape: bf16[36,32], index: 1, kind: input, shape index: {}]   ;;  %s1181_s2 = inlined_call_operand.vmem [shape: f32[1,32], index: 2, kind: input, shape index: {}]   ;;  %s1182_s3 = inlined_call_operand.vmem [shape: bf16[1,256], index: 3, kind: input, shape index: {}]   ;;  %s1183_s4 = inlined_call_operand.vmem [shape: bf16[32,128], index: 4, kind: input, shape index: {}]   ;;  %s1184_s5 = inlined_call_operand.vmem [shape: f32[1,128], index: 5, kind: input, shape index: {}]   ;;  %s1185_s6 = inlined_call_operand.hbm [shape: f32[2,1,128], index: 6, kind: output, shape index: {}]  }
   0x1   :  { %13 = vsyncpa [#allocation3 + $0x1], 0  ;;  %s984_s21 = smov 0   ;;  %s986_s22 = smov 0  }
   0x2   :  { %s988_s23 = smov 0   ;;  %s990_s24 = smov 0  }
   0x3 LB: > { %s1005_s25 = sadd.s32 4294967295, %s947_s24   ;;  %s713_s26 = sadd.s32 4294967294, %s947_s24   ;;  %s947_s24 = sphi %s990_s24, %s1191_s24   ;;  %s943_s23 = sphi %s988_s23, %s1190_s23   ;;  %s939_s22 = sphi %s986_s22, %s1189_s22   ;;  %s935_s21 = sphi %s984_s21, %s1188_s21  }
   0x4   : > { %s1009_s27 = sadd.s32 1, %s947_s24   ;;  %s157_s28 = sadd.s32 1, %s943_s23 }
   0x5   : > { %s154_s29 = ssub.s32 %s947_s24, %s1009_s27  ;;  %p167_p0 = scmp.ne.s32.totalorder %s943_s23, %s939_s22 }
   0x6   : > { %p155_p1 = scmp.eq.s32.totalorder %s154_s29, 0  ;;  %p168_p2 = scmp.eq.s32.totalorder %s1005_s25, 1 }
   0x7   : > { %p173_p3 = scmp.ne.s32.totalorder %s939_s22, %s935_s21  ;;  %p174_p4 = scmp.eq.s32.totalorder %s713_s26, 1 }
   0x8   : > { %s1020_s30 = scalar_select %p155_p1, %s943_s23, %s157_s28  }
   0x9   : > { %p1022_p5 = por %p168_p2, %p167_p0  ;;  %p1026_p6 = por %p174_p4, %p173_p3 }
   0xa   : > { %p716_p7 = scmp.ge.s32.totalorder %s947_s24, 1  ;;  %p215_p8 = scmp.lt.s32.totalorder %s947_s24, 3 }
   0xc   : > { %p216_p9 = pnand %p716_p7, %p215_p8 }
   0xd   : > { %p244_p10 = scmp.lt.s32.totalorder (!%p216_p9), %s1005_s25, 1  ;;  %s242_s13 = sand.u32 (!%p216_p9), 1, %s939_s22  }
   0xe   : > { %219 = sbr.rel (%p216_p9) target bundleno = 553 (0x229), region = 44  ;;  %s654_s16 = scalar_lea.hbm (!%p216_p9), %s1185_s6, %s1005_s25 }
   0xf   : > { %s658_s26 = sshll.u32 (!%p216_p9), %s654_s16, 4  ;;  %s646_s28 = scalar_lea.sflag (!%p216_p9), [#allocation3], %s242_s13  ;;  %s659_s26 = int_to_ptr.hbm [resolvable:$true] %s658_s26 }
  0x10   : > { %s899_s29 = sshra.s32 (!%p216_p9), %s659_s26, 4  ;;  %s900_s29 = int_to_ptr.hbm [resolvable:$true] %s899_s29 }
  0x11   : > { %s901_s9 = scalar_lea.hbm (!%p216_p9), %s900_s29, 1  ;;  %p906_p0 = scmp.lt.s32.totalorder (!%p216_p9), %s900_s29, %s1185_s6 }
  0x12   : > { %p902_p11 = scmp.ne.s32.totalorder (!%p216_p9), %s900_s29, %s901_s9 }
  0x13   : > { %v286_v0 = vld [vmem:[%s1180_s1 + $0x10] sm:$0x3]  ;;  %vm435_vm0 = vcmask 1041408   ;;  %s245_s11 = scalar_select %p244_p10, %s1005_s25, 1  ;;  %v836_v4 = vld [vmem:[%s1180_s1 + $0x8] sm:$0xff]  ;;  %v835_v5 = vld [vmem:[%s1180_s1] sm:$0xff] }
  0x14   : > { %v380_v1 = vunpack.c.l.b16 %v286_v0  ;;  %vm386_vm1 = vcmask 293888   ;;  %v1083_v24 = vld [vmem:[%s1181_s2] ss:$0 sm:$0xff]  ;;  %vm627_vm2 = vcmask 261120   ;;  %p903_p12 = pnand %p902_p11, %p1022_p5 }
  0x15   : > { %s818_s14 = sshll.u32 %s245_s11, 7  ;;  %s905_s11 = scalar_lea.hbm %s1185_s6, 2 }
  0x16   : > { %v383_v2 = vpack.c.b16 %v380_v1, %v380_v1  ;;  %s1046_s19 = scalar_lea.vmem %s1179_s0, %s818_s14  ;;  %p904_p13 = pneg %p903_p12 }
  0x17   : > { %v819_v6 = vld [vmem:[%s1046_s19] sm:$0xff]  ;;  %v830_v7 = vld [vmem:[%s1046_s19 + $0x58] sm:$0xff]  ;;  %v825_v8 = vld [vmem:[%s1046_s19 + $0x30] sm:$0xff]  ;;  %p907_p1 = scmp.lt.s32.totalorder %s905_s11, %s901_s9 }
  0x18   : > { %v437_v3 = vsel %vm435_vm0, %v383_v2, 0  ;;  %v820_v9 = vld [vmem:[%s1046_s19 + $0x8] sm:$0xff]  ;;  %v831_v10 = vld [vmem:[%s1046_s19 + $0x60] sm:$0xff]  ;;  %v826_v11 = vld [vmem:[%s1046_s19 + $0x38] sm:$0xff] }
  0x19   : > { %444 = vmatpush.bf16.msra.mxu0 %v437_v3  ;;  %840 = vmatpush.bf16.msra.mxu3 %v437_v3  ;;  %v821_v12 = vld [vmem:[%s1046_s19 + $0x10] sm:$0xff]  ;;  %v832_v13 = vld [vmem:[%s1046_s19 + $0x68] sm:$0xff]  ;;  %v827_v14 = vld [vmem:[%s1046_s19 + $0x40] sm:$0xff]  ;;  %p908_p2 = por %p907_p1, %p906_p0 }
  0x1a   : > { %839 = vmatpush.bf16.msra.mxu1 %v437_v3  ;;  %v822_v15 = vld [vmem:[%s1046_s19 + $0x18] sm:$0xff]  ;;  %v833_v16 = vld [vmem:[%s1046_s19 + $0x70] sm:$0xff]  ;;  %v828_v17 = vld [vmem:[%s1046_s19 + $0x48] sm:$0xff] }
  0x1b   : > { %v823_v18 = vld [vmem:[%s1046_s19 + $0x20] sm:$0xff]  ;;  %v834_v19 = vld [vmem:[%s1046_s19 + $0x78] sm:$0xff]  ;;  %v829_v20 = vld [vmem:[%s1046_s19 + $0x50] sm:$0xff]  ;;  %p909_p3 = pnand %p908_p2, %p904_p13 }
  0x1c   : > { %v824_v21 = vld [vmem:[%s1046_s19 + $0x28] sm:$0xff]  ;;  %s243_s19 = scalar_lea.vmem [#allocation2], %s242_s13 }
  0x1d   : > { %445 = vmatpush.bf16.msra.mxu0 %v836_v4  ;;  %842 = vmatpush.bf16.msra.mxu3 %v836_v4  ;;  %s656_s20 = sshll.u32 %s243_s19, 4  ;;  %s657_s20 = int_to_ptr.vmem [resolvable:$true] %s656_s20 }
  0x1e   : > { %841 = vmatpush.bf16.msra.mxu1 %v836_v4 }
  0x21   : > { %446 = vmatpush.bf16.msra.mxu0 %v835_v5  ;;  %844 = vmatpush.bf16.msra.mxu3 %v835_v5 }
  0x22   : > { %843 = vmatpush.bf16.msra.mxu1 %v835_v5 }
  0x24   : > { %791 = vmatmul.msk.bf16.vlgmr.msra.gmra.mxu0 %vm386_vm1, %v819_v6  ;;  %802 = vmatmul.msk.bf16.vlgmr.msra.gmra.mxu3 %vm386_vm1, %v830_v7 }
  0x25   : > { %797 = vmatmul.msk.bf16.vlgmr.msra.gmra.mxu1 %vm386_vm1, %v825_v8 }
  0x34   : > { %792 = vmatmul.msk.bf16.gmra.mxu0 %vm386_vm1, %v820_v9  ;;  %803 = vmatmul.msk.bf16.gmra.mxu3 %vm386_vm1, %v831_v10 }
  0x35   : > { %798 = vmatmul.msk.bf16.gmra.mxu1 %vm386_vm1, %v826_v11  ;;  %v560_v11 = vld [vmem:[%s1182_s3] sm:$0x3] }
  0x36   : > { %578 = vst [vmem:[#allocation1] ss:$9 sm:$0xff] %v560_v11 }
  0x44   : > { %793 = vmatmul.msk.bf16.gmra.mxu0 %vm386_vm1, %v821_v12  ;;  %804 = vmatmul.msk.bf16.gmra.mxu3 %vm386_vm1, %v832_v13 }
  0x45   : > { %799 = vmatmul.msk.bf16.gmra.mxu1 %vm386_vm1, %v827_v14 }
  0x54   : > { %794 = vmatmul.msk.bf16.gmra.mxu0 %vm386_vm1, %v822_v15  ;;  %805 = vmatmul.msk.bf16.gmra.mxu3 %vm386_vm1, %v833_v16 }
  0x55   : > { %800 = vmatmul.msk.bf16.gmra.mxu1 %vm386_vm1, %v828_v17 }
  0x64   : > { %795 = vmatmul.msk.bf16.gmra.mxu0 %vm386_vm1, %v823_v18  ;;  %806 = vmatmul.msk.bf16.gmra.mxu3 %vm386_vm1, %v834_v19 }
  0x65   : > { %801 = vmatmul.msk.bf16.gmra.mxu1 %vm386_vm1, %v829_v20 }
  0x74   : > { %796 = vmatmul.msk.bf16.gmra.mxu0 %vm386_vm1, %v824_v21 }
  0xa1   : > { %v448_v22 = vpop.f32.mrf.mxu0 }
  0xa2   : > { %v478_v23 = vpop.f32.mrf.mxu1  ;;  %v449_v26 = vadd.f32 %v1083_v24, %v448_v22 }
  0xa3   : > { %v479_v47 = vadd.f32 %v1083_v24, %v478_v23 }
  0xa4   : > { %v528_v30 = vmax.f32 %v449_v26, 0.0 }
  0xa5   : > { %v540_v55 = vmax.f32 %v479_v47, 0.0 }
  0xa7   : > { %v503_v25 = vpop.f32.mrf.mxu3 }
  0xa8   : > { %v504_v32 = vadd.f32 %v1083_v24, %v503_v25 }
  0xa9   : > { %v450_v27 = vpop.f32.mrf.mxu0 }
  0xaa   : > { %v451_v28 = vadd.f32 %v1083_v24, %v450_v27  ;;  %v480_v29 = vpop.f32.mrf.mxu1  ;;  %v550_v37 = vmax.f32 %v504_v32, 0.0 }
  0xab   : > { %v481_v48 = vadd.f32 %v1083_v24, %v480_v29 }
  0xac   : > { %v529_v31 = vmax.f32 %v451_v28, 0.0  ;;  %v838_v28 = vld [vmem:[%s1183_s4 + $0x8] sm:$0xff] }
  0xad   : > { %v541_v56 = vmax.f32 %v481_v48, 0.0  ;;  %637 = vmatpush.bf16.msrb.mxu3 %v838_v28 }
  0xae   : > { %v1088_v33 = vpack.c.bf16 %v529_v31, %v528_v30 }
  0xaf   : > { %v505_v34 = vpop.f32.mrf.mxu3  ;;  %v567_v60 = vpack.c.bf16 %v541_v56, %v540_v55 }
  0xb0   : > { %v506_v35 = vadd.f32 %v1083_v24, %v505_v34 }
  0xb1   : > { %v453_v36 = vpop.f32.mrf.mxu0 }
  0xb2   : > { %v551_v38 = vmax.f32 %v506_v35, 0.0  ;;  %v483_v39 = vpop.f32.mrf.mxu1  ;;  %v454_v43 = vadd.f32 %v1083_v24, %v453_v36  ;;  %v837_v35 = vld [vmem:[%s1183_s4] sm:$0xff] }
  0xb3   : > { %v484_v42 = vadd.f32 %v1083_v24, %v483_v39  ;;  %638 = vmatpush.bf16.msrb.mxu3 %v837_v35 }
  0xb4   : > { %v1091_v40 = vpack.c.bf16 %v551_v38, %v550_v37  ;;  %v530_v51 = vmax.f32 %v454_v43, 0.0 }
  0xb5   : > { %v542_v49 = vmax.f32 %v484_v42, 0.0 }
  0xb7   : > { %v508_v41 = vpop.f32.mrf.mxu3 }
  0xb8   : > { %v509_v32 = vadd.f32 %v1083_v24, %v508_v41 }
  0xb9   : > { %v455_v44 = vpop.f32.mrf.mxu0 }
  0xba   : > { %v456_v45 = vadd.f32 %v1083_v24, %v455_v44  ;;  %v485_v46 = vpop.f32.mrf.mxu1 }
  0xbb   : > { %v486_v50 = vadd.f32 %v1083_v24, %v485_v46  ;;  %v552_v46 = vmax.f32 %v509_v32, 0.0 }
  0xbc   : > { %v531_v52 = vmax.f32 %v456_v45, 0.0 }
  0xbd   : > { %v543_v53 = vmax.f32 %v486_v50, 0.0 }
  0xbe   : > { %v1099_v54 = vpack.c.bf16 %v531_v52, %v530_v51 }
  0xbf   : > { %v510_v57 = vpop.f32.mrf.mxu3  ;;  %v568_v58 = vpack.c.bf16 %v543_v53, %v542_v49 }
  0xc0   : > { %v511_v27 = vadd.f32 %v1083_v24, %v510_v57 }
  0xc1   : > { %v1101_v59 = vpop.f32.mrf.mxu0  ;;  %583 = vmatpush.bf16.msrb.mxu1 %v568_v58 }
  0xc2   : > { %v1103_v63 = vpop.f32.mrf.mxu1  ;;  %v553_v39 = vmax.f32 %v511_v27, 0.0 }
  0xc4   : > { %v573_v50 = vpack.c.bf16 %v553_v39, %v552_v46 }
  0xc5   : > { %584 = vmatpush.bf16.msrb.mxu1 %v567_v60  ;;  %v459_v60 = vadd.f32 %v1083_v24, %v1101_v59 }
  0xc7   : > { %v513_v61 = vpop.f32.mrf.mxu3 }
  0xc8   : > { %v514_v25 = vadd.f32 %v1083_v24, %v513_v61 }
  0xc9   : > { %v460_v62 = vpop.f32.mrf.mxu0 }
  0xca   : > { %v1105_v2 = vpop.f32.mrf.mxu1  ;;  %v554_v36 = vmax.f32 %v514_v25, 0.0  ;;  %v461_v56 = vadd.f32 %v1083_v24, %v460_v62  ;;  %v489_v62 = vadd.f32 %v1083_v24, %v1103_v63  ;;  %v580_v63 = vld [vmem:[#allocation1 + $0x9] sm:$0xff] }
  0xcf   : > { %v515_v0 = vpop.f32.mrf.mxu3 }
  0xd0   : > { %v516_v21 = vadd.f32 %v1083_v24, %v515_v0 }
  0xd1   : > { %v463_v1 = vpop.f32.mrf.mxu0 }
  0xd2   : > { %v493_v6 = vpop.f32.mrf.mxu1  ;;  %v555_v29 = vmax.f32 %v516_v21, 0.0  ;;  %v464_v51 = vadd.f32 %v1083_v24, %v463_v1 }
  0xd3   : > { %v494_v61 = vadd.f32 %v1083_v24, %v493_v6 }
  0xd4   : > { %v574_v45 = vpack.c.bf16 %v555_v29, %v554_v36  ;;  %v534_v0 = vmax.f32 %v464_v51, 0.0 }
  0xd5   : > { %v546_v59 = vmax.f32 %v494_v61, 0.0 }
  0xd7   : > { %v518_v3 = vpop.f32.mrf.mxu3 }
  0xd8   : > { %v519_v17 = vadd.f32 %v1083_v24, %v518_v3 }
  0xd9   : > { %v465_v4 = vpop.f32.mrf.mxu0 }
  0xda   : > { %v495_v10 = vpop.f32.mrf.mxu1  ;;  %v556_v26 = vmax.f32 %v519_v17, 0.0  ;;  %v466_v47 = vadd.f32 %v1083_v24, %v465_v4 }
  0xdb   : > { %v496_v3 = vadd.f32 %v1083_v24, %v495_v10 }
  0xdc   : > { %v535_v57 = vmax.f32 %v466_v47, 0.0 }
  0xdd   : > { %v547_v11 = vmax.f32 %v496_v3, 0.0 }
  0xdf   : > { %v520_v5 = vpop.f32.mrf.mxu3 }
  0xe0   : > { %v521_v14 = vadd.f32 %v1083_v24, %v520_v5  ;;  %v533_v5 = vmax.f32 %v461_v56, 0.0 }
  0xe1   : > { %v468_v7 = vpop.f32.mrf.mxu0 }
  0xe2   : > { %v498_v20 = vpop.f32.mrf.mxu1  ;;  %v557_v22 = vmax.f32 %v521_v14, 0.0  ;;  %v469_v42 = vadd.f32 %v1083_v24, %v468_v7  ;;  %v564_v7 = vpack.c.bf16 %v535_v57, %v534_v0  ;;  %v570_v14 = vpack.c.bf16 %v547_v11, %v546_v59 }
  0xe3   : > { %v499_v53 = vadd.f32 %v1083_v24, %v498_v20 }
  0xe4   : > { %v575_v31 = vpack.c.bf16 %v557_v22, %v556_v26  ;;  %v536_v52 = vmax.f32 %v469_v42, 0.0 }
  0xe5   : > { %v548_v1 = vmax.f32 %v499_v53, 0.0 }
  0xe7   : > { %v523_v8 = vpop.f32.mrf.mxu3 }
  0xe8   : > { %v524_v12 = vadd.f32 %v1083_v24, %v523_v8  ;;  %v532_v8 = vmax.f32 %v459_v60, 0.0 }
  0xe9   : > { %v470_v9 = vpop.f32.mrf.mxu0 }
  0xea   : > { %v558_v18 = vmax.f32 %v524_v12, 0.0  ;;  %v471_v37 = vadd.f32 %v1083_v24, %v470_v9  ;;  %v500_v41 = vpop.f32.mrf.mxu1  ;;  %v491_v9 = vadd.f32 %v1083_v24, %v1105_v2  ;;  %v563_v10 = vpack.c.bf16 %v533_v5, %v532_v8 }
  0xeb   : > { %v501_v55 = vadd.f32 %v1083_v24, %v500_v41  ;;  %v544_v12 = vmax.f32 %v489_v62, 0.0 }
  0xec   : > { %v537_v48 = vmax.f32 %v471_v37, 0.0 }
  0xed   : > { %v549_v4 = vmax.f32 %v501_v55, 0.0 }
  0xee   : > { %v565_v58 = vpack.c.bf16 %v537_v48, %v536_v52 }
  0xef   : > { %v525_v13 = vpop.f32.mrf.mxu3  ;;  %v571_v6 = vpack.c.bf16 %v549_v4, %v548_v1 }
  0xf0   : > { %v526_v15 = vadd.f32 %v1083_v24, %v525_v13  ;;  %v545_v13 = vmax.f32 %v491_v9, 0.0 }
  0xf1   : > { %v473_v16 = vpop.f32.mrf.mxu0 }
  0xf2   : > { %v559_v19 = vmax.f32 %v526_v15, 0.0  ;;  %v474_v30 = vadd.f32 %v1083_v24, %v473_v16 }
  0xf4   : > { %v576_v23 = vpack.c.bf16 %v559_v19, %v558_v18  ;;  %v538_v43 = vmax.f32 %v474_v30, 0.0 }
  0xf6   : > { %596 = vmatpush.bf16.msra.mxu2 %v576_v23 }
  0xf9   : > { %v475_v34 = vpop.f32.mrf.mxu0 }
  0xfa   : > { %v476_v38 = vadd.f32 %v1083_v24, %v475_v34  ;;  %597 = vmatpush.bf16.msra.mxu2 %v575_v31  ;;  %v579_v24 = vld [vmem:[#allocation1] sm:$0xff] }
  0xfc   : > { %v539_v44 = vmax.f32 %v476_v38, 0.0 }
  0xfe   : > { %598 = vmatpush.bf16.msra.mxu2 %v574_v45  ;;  %v566_v49 = vpack.c.bf16 %v539_v44, %v538_v43 }
 0x100   : > { %585 = vmatpush.bf16.msrb.mxu1 %v566_v49 }
 0x102   : > { %599 = vmatpush.bf16.msra.mxu2 %v573_v50 }
 0x104   : > { %586 = vmatpush.bf16.msrb.mxu1 %v565_v58 }
 0x106   : > { %600 = vmatpush.bf16.msra.mxu2 %v1091_v40  ;;  %v569_v40 = vpack.c.bf16 %v545_v13, %v544_v12 }
 0x108   : > { %587 = vmatpush.bf16.msrb.mxu1 %v564_v7 }
 0x10a   : > { %601 = vmatpush.bf16.msra.mxu2 %v571_v6 }
 0x10c   : > { %588 = vmatpush.bf16.msrb.mxu1 %v563_v10 }
 0x10e   : > { %602 = vmatpush.bf16.msra.mxu2 %v570_v14 }
 0x110   : > { %589 = vmatpush.bf16.msrb.mxu1 %v1099_v54 }
 0x112   : > { %603 = vmatpush.bf16.msra.mxu2 %v569_v40 }
 0x114   : > { %590 = vmatpush.bf16.msrb.mxu1 %v1088_v33  ;;  %v614_v33 = vld [vmem:[%s1184_s5] sm:$0x1] }
 0x115   : > { %604 = vmatmul.bf16.vlgmr.msra.gmra.mxu2 %v580_v63 }
 0x117   : > { %591 = vmatmul.bf16.vlgmr.msrb.gmra.mxu1 %v579_v24 }
 0x194   : > { %v592_v2 = vpop.f32.mrf.mxu1 }
 0x198   : > { %v605_v15 = vpop.f32.mrf.mxu2 }
 0x199   : > { %v606_v16 = vadd.f32 %v605_v15, %v592_v2 }
 0x19b   : > { %v609_v17 = vpack.c.bf16 %v606_v16, %v606_v16 }
 0x19c   : > { %v594_v18 = vpop.f32.mrf.mxu1 }
 0x19d   : > { %815 = vmatmul.msk.bf16.vlgmr.msrb.gmra.mxu3 %vm627_vm2, %v609_v17 }
 0x1a0   : > { %v607_v19 = vpop.f32.mrf.mxu2 }
 0x220   : > { %v640_v54 = vpop.f32.mrf.mxu3 }
 0x221   : > { %v641_v20 = vadd.f32 %v640_v54, %v614_v33 }
 0x223   : > { %644 = vst [vmem:[%s243_s19] sm:$0x1] %v641_v20 }
 0x224   : > { %912 = shalt.err (!%p909_p3)
}
 0x225   : > { %845 = dma.vmem_to_hbm [thread:$0]  (%p1022_p5), %s657_s20, 16, %s659_s26, %s646_s28  }
 0x228   : > { %v642_v21 = vpop.f32.mrf.mxu3 }
 0x229 PF: > { %p851_p4 = scmp.ge.s32.totalorder %s947_s24, 2  ;;  %s670_s13 = sand.u32 1, %s935_s21  }
 0x22a   : > { %s671_s15 = scalar_lea.sflag [#allocation3], %s670_s13 }
 0x22b   : > { %p848_p7 = pnand %p851_p4, %p1026_p6 }
 0x22d   : > { %p849_p8 = pneg %p848_p7 }
 0x22f   : > { %930 = dma.done.wait (%p849_p8), %s671_s15, 16  }
 0x230   : > { %932 = vsyncadd (%p849_p8), %s671_s15, 4294967280  ;;  %p16_p9 = scmp.ge.s32.totalorder %s1009_s27, 4   ;;  %s1188_s21 = smov %s939_s22 }
 0x231   : > { %s1189_s22 = smov %s943_s23  ;;  %s1190_s23 = smov %s1020_s30 }
 0x232   : > { %s1191_s24 = smov %s1009_s27  ;;  %18 = sbr.rel (!%p16_p9) target bundleno = 3 (0x3), region = 79 }
 0x237   :  { %676 = vsyncpa [#allocation3], 1 }
 0x238   :  { %678 = vsyncpa [#allocation3 + $0x1], 1 }

</bundles_post_ra>
